<compile_context>
chip_gen: v7x
topology: tpu7x:2x2x1
jax: 0.10.0
libtpu: 0.0.40
codegen_flags: <defaults>
</compile_context>

<pallas_src>
import jax
import jax.numpy as jnp
from jax.experimental import pallas as pl
from jax.experimental.pallas import tpu as pltpu

_LANE_COLS = 1024        # lane-dense slab width (multiple of 128)
_MAX_TILE_ROWS = 512     # 512 x 1024 f32 = 2 MiB per block


# ---------------------------------------------------------------------------
# Kernel: broadcast FMA on the VPU (weight/bias live in SMEM)
# ---------------------------------------------------------------------------
def _linear_1x1_kernel(x_ref, w_ref, b_ref, o_ref):
    # x_ref: (TR, 1024) VMEM   w_ref: (1, 1) SMEM   b_ref: (1,) SMEM
    # o_ref: (TR, 1024) VMEM
    o_ref[...] = x_ref[...] * w_ref[0, 0] + b_ref[0]


def _choose_tiling(batch):
    """Lane-dense tiling for a length-`batch` vector viewed as (rows, 1024).

    Returns (rows, tile_rows) with tile_rows | rows, tile_rows % 8 == 0,
    tile_rows <= _MAX_TILE_ROWS (so a block is at most 2 MiB of f32)."""
    rows = -(-batch // _LANE_COLS)                 # rows needed for the data
    rows = max(8, ((rows + 7) // 8) * 8)           # sublane granularity
    if rows <= 8:
        return rows, rows                          # single tiny block
    if rows <= 2 * _MAX_TILE_ROWS:
        # Small/medium batch: exactly 2 grid programs so the "parallel" axis
        # can shard across v7x's two TensorCores.
        rows = ((rows + 15) // 16) * 16
        return rows, rows // 2
    # Large batch: 2 MiB tiles, rows padded up to a tile multiple.
    rows = ((rows + _MAX_TILE_ROWS - 1) // _MAX_TILE_ROWS) * _MAX_TILE_ROWS
    return rows, _MAX_TILE_ROWS


@jax.jit
def pallas_linear(x, weight, bias):
    """y = x @ weight.T + bias, matching torch.nn.Linear(1, 1) semantics.

    x:      (B, 1)  float32
    weight: (1, 1)  float32  (PyTorch convention: [out_features, in_features])
    bias:   (1,)    float32
    returns (B, 1)  float32
    """
    B, K = x.shape
    N, K2 = weight.shape
    assert K == 1 and K2 == 1 and N == 1, "kernel is specialized to Linear(1, 1)"

    rows, tile_rows = _choose_tiling(B)
    padded = rows * _LANE_COLS

    # Lane-dense slab: pad the flat batch and view it as (rows, 1024).
    x_flat = x.reshape(B)
    if padded != B:
        x_flat = jnp.pad(x_flat, (0, padded - B))
    x2d = x_flat.reshape(rows, _LANE_COLS)

    grid = (rows // tile_rows,)

    cost = pl.CostEstimate(
        flops=2 * padded,                       # one mul + one add per element
        transcendentals=0,
        bytes_accessed=2 * 4 * padded + 8,      # read slab, write slab, w + b
    )

    y2d = pl.pallas_call(
        _linear_1x1_kernel,
        out_shape=jax.ShapeDtypeStruct((rows, _LANE_COLS), x.dtype),
        grid=grid,
        in_specs=[
            pl.BlockSpec((tile_rows, _LANE_COLS), lambda i: (i, 0)),   # x slab (VMEM)
            pl.BlockSpec(memory_space=pltpu.MemorySpace.SMEM),         # weight scalar
            pl.BlockSpec(memory_space=pltpu.MemorySpace.SMEM),         # bias scalar
        ],
        out_specs=pl.BlockSpec((tile_rows, _LANE_COLS), lambda i: (i, 0)),
        input_output_aliases={0: 0},            # y reuses x-slab's HBM buffer
        compiler_params=pltpu.CompilerParams(
            dimension_semantics=("parallel",),  # shards across TCs on v7x
        ),
        cost_estimate=cost,
    )(x2d, weight, bias)

    # Undo the lane-dense padding: back to (B, 1); padded rows never escape.
    return y2d.reshape(padded)[:B].reshape(B, 1)


# ---------------------------------------------------------------------------
# Model wrapper: deterministic parameter init mimicking nn.Linear(1, 1)
# ---------------------------------------------------------------------------
def init_model_params(key):
    # PyTorch nn.Linear init: U(-1/sqrt(in_features), 1/sqrt(in_features)).
    in_features, out_features = 1, 1
    bound = 1.0 / jnp.sqrt(jnp.float32(in_features))
    k_w, k_b = jax.random.split(key)
    weight = jax.random.uniform(
        k_w, (out_features, in_features), jnp.float32, -bound, bound)
    bias = jax.random.uniform(
        k_b, (out_features,), jnp.float32, -bound, bound)
    return weight, bias


def model_forward(params, x):
    weight, bias = params
    return pallas_linear(x, weight, bias)


if __name__ == "__main__":
    key = jax.random.PRNGKey(0)
    params = init_model_params(key)
    weight, bias = params

    # Same input as the PyTorch snippet: hour_var = [[4.0]], shape (1, 1).
    x = jnp.array([[4.0]], dtype=jnp.float32)
    y_pred = jax.block_until_ready(model_forward(params, x))
    y_ref = x @ weight.T + bias
    assert y_pred.shape == (1, 1)
    assert jnp.allclose(y_pred, y_ref, atol=1e-6), (y_pred, y_ref)

    # A batch that is not a multiple of anything, to exercise the pad-to-tile
    # path and the 2-program "parallel" grid.
    xb = jax.random.normal(jax.random.PRNGKey(1), (20000, 1), jnp.float32)
    yb = jax.block_until_ready(model_forward(params, xb))
    assert yb.shape == (20000, 1)
    assert jnp.allclose(yb, xb @ weight.T + bias, atol=1e-5)

    print("KERNEL_OK")
</pallas_src>

<mosaic_0001>
module attributes {stable_mosaic.version = 11 : i64} {
  func.func @_linear_1x1_kernel(%arg0: i32, %arg1: memref<8x1024xf32, #tpu.memory_space<vmem>>, %arg2: memref<1x1xf32, #tpu.memory_space<smem>>, %arg3: memref<1xf32, #tpu.memory_space<smem>>, %arg4: memref<8x1024xf32, #tpu.memory_space<vmem>>) attributes {dimension_semantics = [#tpu.dimension_semantics<parallel>], iteration_bounds = array<i64: 1>, scalar_prefetch = 0 : i64, scratch_operands = 0 : i64, tpu.core_type = #tpu.core_type<tc>, window_params = [{transform_indices = @transform_0, window_bounds = array<i64: 8, 1024>}, {transform_indices = @transform_1, window_bounds = array<i64: 1, 1>}, {transform_indices = @transform_2, window_bounds = array<i64: 1>}, {transform_indices = @transform_3, window_bounds = array<i64: 8, 1024>}]} {
    %c0 = arith.constant 0 : index
    %c0_0 = arith.constant 0 : index
    %0 = vector.load %arg1[%c0, %c0_0] : memref<8x1024xf32, #tpu.memory_space<vmem>>, vector<8x1024xf32>
    %c0_1 = arith.constant 0 : index
    %c0_2 = arith.constant 0 : index
    %1 = memref.load %arg2[%c0_1, %c0_2] : memref<1x1xf32, #tpu.memory_space<smem>>
    %2 = vector.broadcast %1 : f32 to vector<8x1024xf32>
    %3 = arith.mulf %0, %2 : vector<8x1024xf32>
    %c0_3 = arith.constant 0 : index
    %4 = memref.load %arg3[%c0_3] : memref<1xf32, #tpu.memory_space<smem>>
    %5 = vector.broadcast %4 : f32 to vector<8x1024xf32>
    %6 = arith.addf %3, %5 : vector<8x1024xf32>
    %c0_4 = arith.constant 0 : index
    %c0_5 = arith.constant 0 : index
    %7 = vector.load %arg4[%c0_4, %c0_5] : memref<8x1024xf32, #tpu.memory_space<vmem>>, vector<8x1024xf32>
    tpu.vector_store %arg4[%c0_4, %c0_5], %6 {strides = array<i32>} : memref<8x1024xf32, #tpu.memory_space<vmem>>, vector<8x1024xf32>,
    return
  }
  func.func @transform_0(%arg0: i32) -> (i32, i32) {
    %c0_i32 = arith.constant 0 : i32
    %c0_i32_0 = arith.constant 0 : i32
    return %arg0, %c0_i32 : i32, i32
  }
  func.func @transform_1(%arg0: i32) -> (i32, i32) {
    %c0_i32 = arith.constant 0 : i32
    %c0_i32_0 = arith.constant 0 : i32
    %c0_i32_1 = arith.constant 0 : i32
    return %c0_i32, %c0_i32_0 : i32, i32
  }
  func.func @transform_2(%arg0: i32) -> i32 {
    %c0_i32 = arith.constant 0 : i32
    %c0_i32_0 = arith.constant 0 : i32
    return %c0_i32 : i32
  }
  func.func @transform_3(%arg0: i32) -> (i32, i32) {
    %c0_i32 = arith.constant 0 : i32
    %c0_i32_0 = arith.constant 0 : i32
    return %arg0, %c0_i32 : i32, i32
  }
}

</mosaic_0001>

<bundles_post_ra>
// kernel: pallas_linear.1
= control target key start
LH: loop header
LB: loop body
LE: loop exit
PB: predicated region body
PF: predicated region fallthrough
CT: control target
= control target key end

     0   :  { %s130_s0 = inlined_call_operand.vmem [shape: f32[8,1024], index: 0, kind: input, shape index: {}, may-alias: {0,3}]   ;;  %s131_s1 = inlined_call_operand.<no memory space> [shape: f32[1,1], index: 1, kind: input, shape index: {}]   ;;  %s132_s2 = inlined_call_operand.<no memory space> [shape: f32[1], index: 2, kind: input, shape index: {}]   ;;  %s133_s3 = inlined_call_operand.vmem [shape: f32[8,1024], index: 3, kind: output, shape index: {}, may-alias: {0,3}]  }
   0x1   :  { %v16_v0 = vld [vmem:[%s130_s0] sm:$0xff]  ;;  %v25_v1 = vstv %s131_s1  ;;  %v35_v2 = vstv %s132_s2  ;;  %v17_v3 = vld [vmem:[%s130_s0 + $0x8] sm:$0xff] }
   0x2   :  { %v26_v4 = vmul.f32 %v25_v1, %v16_v0  ;;  %v27_v5 = vmul.f32 %v25_v1, %v17_v3  ;;  %v18_v6 = vld [vmem:[%s130_s0 + $0x10] sm:$0xff]  ;;  %v19_v7 = vld [vmem:[%s130_s0 + $0x18] sm:$0xff]  ;;  %v20_v8 = vld [vmem:[%s130_s0 + $0x20] sm:$0xff] }
   0x3   :  { %v28_v9 = vmul.f32 %v25_v1, %v18_v6  ;;  %v29_v10 = vmul.f32 %v25_v1, %v19_v7  ;;  %v30_v11 = vmul.f32 %v25_v1, %v20_v8  ;;  %v21_v12 = vld [vmem:[%s130_s0 + $0x28] sm:$0xff]  ;;  %v22_v13 = vld [vmem:[%s130_s0 + $0x30] sm:$0xff]  ;;  %v23_v14 = vld [vmem:[%s130_s0 + $0x38] sm:$0xff] }
   0x4   :  { %v36_v15 = vadd.f32 %v35_v2, %v26_v4  ;;  %v37_v16 = vadd.f32 %v35_v2, %v27_v5  ;;  %v31_v17 = vmul.f32 %v25_v1, %v21_v12  ;;  %v32_v18 = vmul.f32 %v25_v1, %v22_v13 }
   0x5   :  { %v38_v19 = vadd.f32 %v35_v2, %v28_v9  ;;  %v39_v20 = vadd.f32 %v35_v2, %v29_v10  ;;  %v40_v21 = vadd.f32 %v35_v2, %v30_v11  ;;  %v33_v22 = vmul.f32 %v25_v1, %v23_v14 }
   0x6   :  { %44 = vst [vmem:[%s133_s3] sm:$0xff] %v36_v15  ;;  %45 = vst [vmem:[%s133_s3 + $0x8] sm:$0xff] %v37_v16  ;;  %v41_v23 = vadd.f32 %v35_v2, %v31_v17  ;;  %v42_v24 = vadd.f32 %v35_v2, %v32_v18 }
   0x7   :  { %46 = vst [vmem:[%s133_s3 + $0x10] sm:$0xff] %v38_v19  ;;  %47 = vst [vmem:[%s133_s3 + $0x18] sm:$0xff] %v39_v20  ;;  %v43_v25 = vadd.f32 %v35_v2, %v33_v22 }
   0x8   :  { %48 = vst [vmem:[%s133_s3 + $0x20] sm:$0xff] %v40_v21  ;;  %49 = vst [vmem:[%s133_s3 + $0x28] sm:$0xff] %v41_v23 }
   0x9   :  { %50 = vst [vmem:[%s133_s3 + $0x30] sm:$0xff] %v42_v24  ;;  %51 = vst [vmem:[%s133_s3 + $0x38] sm:$0xff] %v43_v25 }

</bundles_post_ra>
